<compile_context>
chip_gen: v5e
topology: v5e:2x2
jax: 0.10.0
libtpu: 0.0.40
codegen_flags: <defaults>
</compile_context>

<pallas_src>
import functools

import jax
import jax.numpy as jnp
from jax.experimental import pallas as pl
from jax.experimental.pallas import tpu as pltpu

_LANE = 128
_VMEM_LIMIT_BYTES = 48 << 20       # fits v5e/v6e (128 MiB) and v7x (64 MiB phys)
_FUSED_MAX_SLAB_BYTES = 4 << 20    # per-batch [C, H*W] slab threshold for fusion
_FALLBACK_MAX_BLOCK_BYTES = 8 << 20


# ------------------------------ Pallas kernels ------------------------------ #
def _se_fused_kernel(x_ref, w1_ref, b1_ref, w2_ref, b2_ref, o_ref):
    """Single-pass SE: pool + MLP + h_sigmoid + scale on one [1, C, hw] slab.

    x_ref:  (1, C, hw)  full lane-dense spatial slab for one batch element
    w1_ref: (C, Cr)     fc1 weight, pre-transposed, 1/(H*W) folded in
    b1_ref: (1, Cr)
    w2_ref: (Cr, C)     fc2 weight, pre-transposed
    b2_ref: (1, C)
    o_ref:  (1, C, hw)
    """
    x = x_ref[...]                                                  # (1, C, hw)
    s = jnp.sum(x.astype(jnp.float32), axis=-1)                     # (1, C) sum
    # w1 has 1/(H*W) folded in, so s @ w1 == mean @ fc1_w.T
    h = jnp.maximum(
        jnp.dot(s, w1_ref[...], preferred_element_type=jnp.float32)
        + b1_ref[...], 0.0)                                         # (1, Cr)
    z = jnp.dot(h, w2_ref[...], preferred_element_type=jnp.float32) \
        + b2_ref[...]                                               # (1, C)
    gate = (jnp.clip(z + 3.0, 0.0, 6.0) * (1.0 / 6.0)).astype(x.dtype)
    o_ref[...] = x * gate[:, :, None]


def _se_pool_fc_kernel(x_ref, w1_ref, b1_ref, w2_ref, b2_ref,
                       scale_ref, acc_ref, *, hw, thw, needs_mask):
    """Fallback pass 1: spatial sum (lane-wide acc) + fused MLP + h_sigmoid.

    x_ref:     (1, C, thw)  lane-dense spatial tile (tail lanes masked in-kernel)
    scale_ref: (1, C)       per-(batch, channel) gate (written at last tile)
    acc_ref:   (1, C, 128)  f32 lane-wide running partial sums (scratch)
    """
    t = pl.program_id(1)

    @pl.when(t == 0)
    def _():
        acc_ref[...] = jnp.zeros_like(acc_ref)

    x = x_ref[...].astype(jnp.float32)                              # (1, C, thw)
    if needs_mask:
        # Out-of-bounds lane contents are unspecified (no padding in HBM): mask.
        lane = jax.lax.broadcasted_iota(jnp.int32, x.shape, 2)
        x = jnp.where(t * thw + lane < hw, x, 0.0)

    # Lane-wide partial sums: cheap VPU adds per step; the single cross-lane
    # (XLU) reduce happens only once per batch, at the last tile.
    part = x[:, :, 0:_LANE]
    for i in range(1, thw // _LANE):
        part = part + x[:, :, i * _LANE:(i + 1) * _LANE]
    acc_ref[...] += part

    @pl.when(t == pl.num_programs(1) - 1)
    def _():
        s = jnp.sum(acc_ref[...], axis=-1)                          # (1, C)
        h = jnp.maximum(
            jnp.dot(s, w1_ref[...], preferred_element_type=jnp.float32)
            + b1_ref[...], 0.0)
        z = jnp.dot(h, w2_ref[...], preferred_element_type=jnp.float32) \
            + b2_ref[...]
        gate = jnp.clip(z + 3.0, 0.0, 6.0) * (1.0 / 6.0)
        scale_ref[...] = gate.astype(scale_ref.dtype)


def _se_scale_kernel(x_ref, scale_ref, o_ref):
    """Fallback pass 2: lane-dense broadcast multiply out = x * gate[b, c]."""
    gate = scale_ref[...].astype(x_ref.dtype)[:, :, None]           # (1, C, 1)
    o_ref[...] = x_ref[...] * gate


# ------------------------------- wrapper ------------------------------------ #
def _pick_lane_tile(c, hw, itemsize, max_block_bytes=_FALLBACK_MAX_BLOCK_BYTES):
    """Largest 128-multiple lane tile whose [C, tile] block stays under budget."""
    t = pl.cdiv(hw, _LANE) * _LANE
    max_t = max((max_block_bytes // (c * itemsize)) // _LANE * _LANE, _LANE)
    return min(t, max_t)


def se_layer_forward(x_nchw, fc1_w, fc1_b, fc2_w, fc2_b,
                     *, force_two_pass=False, max_lane_tile=None):
    """SELayer.forward.

    x_nchw: [B, C, H, W]
    fc1_w:  [C//r, C]    (PyTorch nn.Linear layout: [out, in])
    fc1_b:  [C//r]
    fc2_w:  [C, C//r]
    fc2_b:  [C]
    returns [B, C, H, W]
    """
    B, C, H, W = x_nchw.shape
    Cr = fc1_w.shape[0]
    hw = H * W
    itemsize = x_nchw.dtype.itemsize

    # Keep NCHW; flatten spatial onto the lane axis (free reshape, no transpose).
    x_flat = x_nchw.reshape(B, C, hw)

    # nn.Linear: y = x @ W.T + b; pre-transpose the constants and fold 1/(H*W)
    # into fc1 so the kernels feed the raw spatial *sum* into the first matmul.
    inv_hw = 1.0 / float(hw)
    w1 = (jnp.transpose(fc1_w) * inv_hw).astype(jnp.float32)        # [C,  Cr]
    w2 = jnp.transpose(fc2_w).astype(jnp.float32)                   # [Cr, C ]
    b1 = fc1_b.reshape(1, Cr).astype(jnp.float32)
    b2 = fc2_b.reshape(1, C).astype(jnp.float32)

    weight_specs = [
        pl.BlockSpec((C, Cr), lambda *_: (0, 0)),                   # fc1 w (resident)
        pl.BlockSpec((1, Cr), lambda *_: (0, 0)),                   # fc1 b
        pl.BlockSpec((Cr, C), lambda *_: (0, 0)),                   # fc2 w (resident)
        pl.BlockSpec((1, C), lambda *_: (0, 0)),                    # fc2 b
    ]

    slab_bytes = C * hw * itemsize
    mlp_flops = 2 * C * Cr * 2                                      # two tiny GEMVs

    # ---------------- fused single-pass path (read x once, write once) -------
    if slab_bytes <= _FUSED_MAX_SLAB_BYTES and not force_two_pass:
        y_flat = pl.pallas_call(
            _se_fused_kernel,
            out_shape=jax.ShapeDtypeStruct((B, C, hw), x_nchw.dtype),
            grid=(B,),
            in_specs=[pl.BlockSpec((1, C, hw), lambda b: (b, 0, 0))] + weight_specs,
            out_specs=pl.BlockSpec((1, C, hw), lambda b: (b, 0, 0)),
            compiler_params=pltpu.CompilerParams(
                dimension_semantics=("parallel",),
                vmem_limit_bytes=_VMEM_LIMIT_BYTES),
            cost_estimate=pl.CostEstimate(
                flops=int(B * (2 * C * hw + mlp_flops)),
                transcendentals=0,
                bytes_accessed=int(2 * B * C * hw * itemsize)),
        )(x_flat, w1, b1, w2, b2)
        return y_flat.reshape(B, C, H, W)

    # ---------------- two-pass fallback (huge C*H*W slabs) --------------------
    thw = _pick_lane_tile(C, hw, itemsize)
    if max_lane_tile is not None:
        thw = max(min(thw, (max_lane_tile // _LANE) * _LANE), _LANE)
    n_hw = pl.cdiv(hw, thw)
    needs_mask = (hw % thw) != 0

    # Pass 1: avg-pool + squeeze/excite MLP + h_sigmoid -> gate [B, C]
    gate = pl.pallas_call(
        functools.partial(_se_pool_fc_kernel, hw=hw, thw=thw, needs_mask=needs_mask),
        out_shape=jax.ShapeDtypeStruct((B, C), jnp.float32),
        grid=(B, n_hw),
        in_specs=[pl.BlockSpec((1, C, thw), lambda b, t: (b, 0, t))] + weight_specs,
        out_specs=pl.BlockSpec((1, C), lambda b, t: (b, 0)),        # resident over t
        scratch_shapes=[pltpu.VMEM((1, C, _LANE), jnp.float32)],
        compiler_params=pltpu.CompilerParams(
            dimension_semantics=("parallel", "arbitrary"),
            vmem_limit_bytes=_VMEM_LIMIT_BYTES),
        cost_estimate=pl.CostEstimate(
            flops=int(B * (C * hw + mlp_flops)),
            transcendentals=0,
            bytes_accessed=int(B * C * hw * itemsize + B * C * 4)),
    )(x_flat, w1, b1, w2, b2)

    # Pass 2: broadcast-multiply x by the gate (lane-dense in/out, fully parallel)
    y_flat = pl.pallas_call(
        _se_scale_kernel,
        out_shape=jax.ShapeDtypeStruct((B, C, hw), x_nchw.dtype),
        grid=(B, n_hw),
        in_specs=[
            pl.BlockSpec((1, C, thw), lambda b, t: (b, 0, t)),
            pl.BlockSpec((1, C), lambda b, t: (b, 0)),
        ],
        out_specs=pl.BlockSpec((1, C, thw), lambda b, t: (b, 0, t)),
        compiler_params=pltpu.CompilerParams(
            dimension_semantics=("parallel", "parallel"),
            vmem_limit_bytes=_VMEM_LIMIT_BYTES),
        cost_estimate=pl.CostEstimate(
            flops=int(B * C * hw),
            transcendentals=0,
            bytes_accessed=int(2 * B * C * hw * itemsize + B * C * 4)),
    )(x_flat, gate)

    return y_flat.reshape(B, C, H, W)


# --------------------------------- main ------------------------------------- #
if __name__ == "__main__":
    def _ref(x, fc1_w, fc1_b, fc2_w, fc2_b):
        mean = x.mean(axis=(2, 3))                                  # [B, C]
        h = jnp.maximum(mean @ fc1_w.T + fc1_b, 0.0)
        z = h @ fc2_w.T + fc2_b
        g = jnp.clip(z + 3.0, 0.0, 6.0) / 6.0
        return x * g[:, :, None, None]

    key = jax.random.PRNGKey(0)

    # ---- test 1: fused single-pass path (default) ----
    B, C, H, W, red = 2, 16, 16, 16, 4
    Cr = C // red
    kx, k1, k2, k3, k4, key = jax.random.split(key, 6)
    x = jax.random.normal(kx, (B, C, H, W), dtype=jnp.float32)
    fc1_w = jax.random.normal(k1, (Cr, C), dtype=jnp.float32) * 0.3
    fc1_b = jax.random.normal(k2, (Cr,), dtype=jnp.float32) * 0.1
    fc2_w = jax.random.normal(k3, (C, Cr), dtype=jnp.float32) * 0.3
    fc2_b = jax.random.normal(k4, (C,), dtype=jnp.float32) * 0.1

    out = jax.block_until_ready(se_layer_forward(x, fc1_w, fc1_b, fc2_w, fc2_b))
    ref = _ref(x, fc1_w, fc1_b, fc2_w, fc2_b)
    assert out.shape == ref.shape, out.shape
    err = float(jnp.max(jnp.abs(out - ref)))
    assert jnp.allclose(out, ref, atol=1e-4, rtol=1e-4), err

    # ---- test 2: two-pass fallback with multiple tiles + masked tail tile ----
    B2, C2, H2, W2 = 2, 16, 20, 20       # hw = 400: 3 full 128-lane tiles + tail
    kx2, key = jax.random.split(key, 2)
    x2 = jax.random.normal(kx2, (B2, C2, H2, W2), dtype=jnp.float32)
    out2 = jax.block_until_ready(
        se_layer_forward(x2, fc1_w, fc1_b, fc2_w, fc2_b,
                         force_two_pass=True, max_lane_tile=128))
    ref2 = _ref(x2, fc1_w, fc1_b, fc2_w, fc2_b)
    err2 = float(jnp.max(jnp.abs(out2 - ref2)))
    assert jnp.allclose(out2, ref2, atol=1e-4, rtol=1e-4), err2

    print("KERNEL_OK")
</pallas_src>

<mosaic_0001>
module attributes {stable_mosaic.version = 11 : i64} {
  func.func @_se_fused_kernel(%arg0: i32, %arg1: memref<1x16x256xf32, #tpu.memory_space<vmem>>, %arg2: memref<16x4xf32, #tpu.memory_space<vmem>>, %arg3: memref<1x4xf32, #tpu.memory_space<vmem>>, %arg4: memref<4x16xf32, #tpu.memory_space<vmem>>, %arg5: memref<1x16xf32, #tpu.memory_space<vmem>>, %arg6: memref<1x16x256xf32, #tpu.memory_space<vmem>>) attributes {dimension_semantics = [#tpu.dimension_semantics<parallel>], iteration_bounds = array<i64: 2>, scalar_prefetch = 0 : i64, scratch_operands = 0 : i64, tpu.core_type = #tpu.core_type<tc>, window_params = [{transform_indices = @transform_0, window_bounds = array<i64: 1, 16, 256>}, {pipeline_mode = #tpu.pipeline_mode<synchronous>, transform_indices = @transform_1, window_bounds = array<i64: 16, 4>}, {pipeline_mode = #tpu.pipeline_mode<synchronous>, transform_indices = @transform_2, window_bounds = array<i64: 1, 4>}, {pipeline_mode = #tpu.pipeline_mode<synchronous>, transform_indices = @transform_3, window_bounds = array<i64: 4, 16>}, {pipeline_mode = #tpu.pipeline_mode<synchronous>, transform_indices = @transform_4, window_bounds = array<i64: 1, 16>}, {transform_indices = @transform_5, window_bounds = array<i64: 1, 16, 256>}]} {
    %c0 = arith.constant 0 : index
    %c0_0 = arith.constant 0 : index
    %c0_1 = arith.constant 0 : index
    %0 = vector.load %arg1[%c0, %c0_0, %c0_1] : memref<1x16x256xf32, #tpu.memory_space<vmem>>, vector<1x16x256xf32>
    %cst = arith.constant dense<0.000000e+00> : vector<1x16xf32>
    %1 = vector.multi_reduction <add>, %0, %cst [2] : vector<1x16x256xf32> to vector<1x16xf32>
    %c0_2 = arith.constant 0 : index
    %c0_3 = arith.constant 0 : index
    %2 = vector.load %arg2[%c0_2, %c0_3] : memref<16x4xf32, #tpu.memory_space<vmem>>, vector<16x4xf32>
    %cst_4 = arith.constant dense<0.000000e+00> : vector<1x4xf32>
    %3 = tpu.matmul %1, %2, %cst_4 {dimension_numbers = #tpu.dot_dimension_numbers<[1], [0], [0], [1], [0, 0, 1, 1], [], []>} : vector<1x16xf32>, vector<16x4xf32>, vector<1x4xf32> -> vector<1x4xf32>
    %c0_5 = arith.constant 0 : index
    %c0_6 = arith.constant 0 : index
    %4 = vector.load %arg3[%c0_5, %c0_6] : memref<1x4xf32, #tpu.memory_space<vmem>>, vector<1x4xf32>
    %5 = arith.addf %3, %4 : vector<1x4xf32>
    %cst_7 = arith.constant 0.000000e+00 : f32
    %6 = vector.broadcast %cst_7 : f32 to vector<1x4xf32>
    %7 = arith.maximumf %5, %6 : vector<1x4xf32>
    %c0_8 = arith.constant 0 : index
    %c0_9 = arith.constant 0 : index
    %8 = vector.load %arg4[%c0_8, %c0_9] : memref<4x16xf32, #tpu.memory_space<vmem>>, vector<4x16xf32>
    %cst_10 = arith.constant dense<0.000000e+00> : vector<1x16xf32>
    %9 = tpu.matmul %7, %8, %cst_10 {dimension_numbers = #tpu.dot_dimension_numbers<[1], [0], [0], [1], [0, 0, 1, 1], [], []>} : vector<1x4xf32>, vector<4x16xf32>, vector<1x16xf32> -> vector<1x16xf32>
    %c0_11 = arith.constant 0 : index
    %c0_12 = arith.constant 0 : index
    %10 = vector.load %arg5[%c0_11, %c0_12] : memref<1x16xf32, #tpu.memory_space<vmem>>, vector<1x16xf32>
    %11 = arith.addf %9, %10 : vector<1x16xf32>
    %cst_13 = arith.constant 3.000000e+00 : f32
    %12 = vector.broadcast %cst_13 : f32 to vector<1x16xf32>
    %13 = arith.addf %11, %12 : vector<1x16xf32>
    %cst_14 = arith.constant 0.000000e+00 : f32
    %cst_15 = arith.constant 6.000000e+00 : f32
    %14 = vector.broadcast %cst_14 : f32 to vector<1x16xf32>
    %15 = arith.maximumf %14, %13 : vector<1x16xf32>
    %16 = vector.broadcast %cst_15 : f32 to vector<1x16xf32>
    %17 = arith.minimumf %16, %15 : vector<1x16xf32>
    %cst_16 = arith.constant 0.166666672 : f32
    %18 = vector.broadcast %cst_16 : f32 to vector<1x16xf32>
    %19 = arith.mulf %17, %18 : vector<1x16xf32>
    %20 = vector.shape_cast %19 : vector<1x16xf32> to vector<1x16x1xf32>
    %21 = vector.broadcast %20 : vector<1x16x1xf32> to vector<1x16x256xf32>
    %22 = arith.mulf %0, %21 : vector<1x16x256xf32>
    %c0_17 = arith.constant 0 : index
    %c0_18 = arith.constant 0 : index
    %c0_19 = arith.constant 0 : index
    %23 = vector.load %arg6[%c0_17, %c0_18, %c0_19] : memref<1x16x256xf32, #tpu.memory_space<vmem>>, vector<1x16x256xf32>
    tpu.vector_store %arg6[%c0_17, %c0_18, %c0_19], %22 {strides = array<i32>} : memref<1x16x256xf32, #tpu.memory_space<vmem>>, vector<1x16x256xf32>,
    return
  }
  func.func @transform_0(%arg0: i32) -> (i32, i32, i32) {
    %c0_i32 = arith.constant 0 : i32
    %c0_i32_0 = arith.constant 0 : i32
    %c0_i32_1 = arith.constant 0 : i32
    return %arg0, %c0_i32, %c0_i32_0 : i32, i32, i32
  }
  func.func @transform_1(%arg0: i32) -> (i32, i32) {
    %c0_i32 = arith.constant 0 : i32
    %c0_i32_0 = arith.constant 0 : i32
    %c0_i32_1 = arith.constant 0 : i32
    return %c0_i32, %c0_i32_0 : i32, i32
  }
  func.func @transform_2(%arg0: i32) -> (i32, i32) {
    %c0_i32 = arith.constant 0 : i32
    %c0_i32_0 = arith.constant 0 : i32
    %c0_i32_1 = arith.constant 0 : i32
    return %c0_i32, %c0_i32_0 : i32, i32
  }
  func.func @transform_3(%arg0: i32) -> (i32, i32) {
    %c0_i32 = arith.constant 0 : i32
    %c0_i32_0 = arith.constant 0 : i32
    %c0_i32_1 = arith.constant 0 : i32
    return %c0_i32, %c0_i32_0 : i32, i32
  }
  func.func @transform_4(%arg0: i32) -> (i32, i32) {
    %c0_i32 = arith.constant 0 : i32
    %c0_i32_0 = arith.constant 0 : i32
    %c0_i32_1 = arith.constant 0 : i32
    return %c0_i32, %c0_i32_0 : i32, i32
  }
  func.func @transform_5(%arg0: i32) -> (i32, i32, i32) {
    %c0_i32 = arith.constant 0 : i32
    %c0_i32_0 = arith.constant 0 : i32
    %c0_i32_1 = arith.constant 0 : i32
    return %arg0, %c0_i32, %c0_i32_0 : i32, i32, i32
  }
}

</mosaic_0001>

<bundles_post_ra>
// kernel: tpu_custom_call.1
= control target key start
LH: loop header
LB: loop body
LE: loop exit
PB: predicated region body
PF: predicated region fallthrough
CT: control target
= control target key end

     0   :  { %10 = vsyncpa [#allocation3], 0  ;;  %s785_s0 = inlined_call_operand.hbm [shape: f32[2,16,256], index: 0, kind: input, shape index: {}]   ;;  %s786_s1 = inlined_call_operand.vmem [shape: f32[16,4], index: 1, kind: input, shape index: {}]   ;;  %s787_s2 = inlined_call_operand.vmem [shape: f32[1,4], index: 2, kind: input, shape index: {}]   ;;  %s788_s3 = inlined_call_operand.vmem [shape: f32[4,16], index: 3, kind: input, shape index: {}]   ;;  %s789_s4 = inlined_call_operand.vmem [shape: f32[1,16], index: 4, kind: input, shape index: {}]   ;;  %s790_s5 = inlined_call_operand.hbm [shape: f32[2,16,256], index: 5, kind: output, shape index: {}]  }
   0x1   :  { %12 = vsyncpa [#allocation3 + $0x1], 0 }
   0x2   :  { %13 = vsyncpa [#allocation4], 0 }
   0x3   :  { %15 = vsyncpa [#allocation4 + $0x1], 0  ;;  %s639_s18 = smov 0   ;;  %s641_s19 = smov 0  }
   0x4   :  { %s643_s20 = smov 0   ;;  %s645_s21 = smov 0  }
   0x5 LB: > { %s660_s22 = sadd.s32 4294967295, %s603_s21   ;;  %s435_s23 = sadd.s32 4294967294, %s603_s21   ;;  %s603_s21 = sphi %s645_s21, %s800_s21   ;;  %s599_s20 = sphi %s643_s20, %s799_s20   ;;  %s595_s19 = sphi %s641_s19, %s798_s19   ;;  %s591_s18 = sphi %s639_s18, %s797_s18  }
   0x6   : > { %s664_s24 = sadd.s32 1, %s603_s21   ;;  %s28_s25 = sadd.s32 1, %s599_s20 }
   0x7   : > { %s25_s26 = ssub.s32 %s603_s21, %s664_s24  ;;  %p35_p0 = scmp.ne.s32.totalorder %s599_s20, %s595_s19 }
   0x8   : > { %p26_p1 = scmp.eq.s32.totalorder %s25_s26, 0  ;;  %p36_p2 = scmp.eq.s32.totalorder %s603_s21, 0 }
   0x9   : > { %p41_p3 = scmp.ne.s32.totalorder %s595_s19, %s591_s18  ;;  %p42_p4 = scmp.eq.s32.totalorder %s660_s22, 0 }
   0xa   : > { %s676_s27 = scalar_select %p26_p1, %s599_s20, %s28_s25  }
   0xb   : > { %p678_p5 = por %p36_p2, %p35_p0  ;;  %p682_p6 = por %p42_p4, %p41_p3 }
   0xc   : > { %p149_p7 = scmp.eq.s32.totalorder %s660_s22, 1  ;;  %p155_p8 = scmp.eq.s32.totalorder %s435_s23, 1 }
   0xd   : > { %p466_p10 = scmp.lt.s32.totalorder %s603_s21, 2  ;;  %s187_s7 = sand.u32 1, %s599_s20  }
   0xe   : > { %p689_p11 = por %p149_p7, %p35_p0  ;;  %p693_p12 = por %p155_p8, %p41_p3 }
   0xf   : > { %s452_s8 = sshll.u32 %s603_s21, 5  ;;  %s438_s9 = sshll.u32 %s187_s7, 5 }
  0x10   : > { %s196_s12 = scalar_lea.hbm %s785_s0, %s452_s8  ;;  %s191_s14 = scalar_lea.vmem [#allocation2], %s438_s9 }
  0x11   : > { %s197_s13 = sshll.u32 %s196_s12, 4  ;;  %s199_s15 = sshll.u32 %s191_s14, 4  ;;  %s198_s13 = int_to_ptr.hbm [resolvable:$true] %s197_s13  ;;  %s200_s15 = int_to_ptr.vmem [resolvable:$true] %s199_s15 }
  0x12   : > { %p704_p13 = pnand %p466_p10, %p678_p5  ;;  %p441_p0 = scmp.ge.s32.totalorder %s603_s21, 1 }
  0x13   : > { %p207_p1 = scmp.lt.s32.totalorder %s603_s21, 3  ;;  %s188_s17 = scalar_lea.sflag [#allocation3], %s187_s7 }
  0x14   : > { %s507_s23 = sshra.s32 %s198_s13, 4  ;;  %p511_p3 = pneg %p704_p13  ;;  %s508_s23 = int_to_ptr.hbm [resolvable:$true] %s507_s23 }
  0x15   : > { %s509_s25 = scalar_lea.hbm %s508_s23, 32  ;;  %s514_s28 = scalar_lea.hbm %s785_s0, 64 }
  0x16   : > { %p510_p2 = scmp.ne.s32.totalorder %s508_s23, %s509_s25  ;;  %p515_p5 = scmp.lt.s32.totalorder %s508_s23, %s785_s0 }
  0x17   : > { %p516_p8 = scmp.lt.s32.totalorder %s514_s28, %s509_s25 }
  0x18   : > { %p512_p4 = pnand %p511_p3, %p510_p2 }
  0x19   : > { %p517_p10 = por %p516_p8, %p515_p5 }
  0x1a   : > { %p513_p7 = pneg %p512_p4 }
  0x1c   : > { %p518_p9 = pnand %p517_p10, %p513_p7 }
  0x1e   : > { %521 = shalt.err (!%p518_p9)
}
  0x1f   : > { %s605_s7 = smov 256   ;;  %s606_s11 = smov 16  }
  0x20   : > { %461 = dma.hbm_to_vmem [thread:$0]  (!%p704_p13), %s198_s13, 512, %s200_s15, %s188_s17, %s605_s7, %s605_s7, %s606_s11  }
  0x21   : > { %p208_p2 = pnand %p441_p0, %p207_p1 }
  0x22   : > { %s725_s12 = sand.u32 (!%p208_p2), 1, %s595_s19  }
  0x23   : > { %211 = sbr.rel (%p208_p2) target bundleno = 577 (0x241), region = 40  ;;  %s442_s14 = sshll.u32 (!%p208_p2), %s725_s12, 5 }
  0x24   : > { %s214_s23 = scalar_lea.sflag (!%p208_p2), [#allocation3], %s725_s12  ;;  %s217_s25 = scalar_lea.vmem (!%p208_p2), [#allocation2], %s442_s14 }
  0x28   : > { %582 = dma.done.wait (%p682_p6), %s214_s23, 512  }
  0x29   : > { %584 = vsyncadd (%p682_p6), %s214_s23, 4294966784  ;;  %v245_v0 = vld [vmem:[%s217_s25] sm:$0xff]  ;;  %v246_v1 = vld [vmem:[%s217_s25 + $0x8] sm:$0xff]  ;;  %v260_v8 = vlaneseq  ;;  %vm265_vm0 = vcmask 130112   ;;  %vm267_vm1 = vcmask 130048   ;;  %vm297_vm2 = vcmask 1043456  }
  0x2a   : > { %v249_v2 = vadd.f32 %v246_v1, %v245_v0  ;;  %v247_v3 = vld [vmem:[%s217_s25 + $0x10] sm:$0xff]  ;;  %v248_v4 = vld [vmem:[%s217_s25 + $0x18] sm:$0xff]  ;;  %v256_v6 = vld [vmem:[%s786_s1 + $0x8] sm:$0xff]  ;;  %vm293_vm3 = vcmask 31744   ;;  %s244_s7 = scalar_lea.vmem [#allocation5], %s442_s14  ;;  %s453_s11 = sshll.u32 %s660_s22, 5 }
  0x2b   : > { %v252_v5 = vadd.f32 %v248_v4, %v247_v3  ;;  %284 = vmatpush.msra.mxu0 %v256_v6  ;;  %v255_v7 = vld [vmem:[%s786_s1] sm:$0xff]  ;;  %v261_v10 = vand.u32 127, %v260_v8  ;;  %v327_v21 = vshrl.u32 %v260_v8, 7  ;;  %s358_s13 = scalar_lea.hbm %s790_s5, %s453_s11  ;;  %s359_s15 = sshll.u32 %s244_s7, 4  ;;  %s360_s15 = int_to_ptr.vmem [resolvable:$true] %s359_s15 }
  0x2c   : > { %250 = vadd.xlane.f32.xlu0 %v249_v2  ;;  %v291_v16 = vld [vmem:[%s788_s3] sm:$0xf]  ;;  %s361_s16 = sshll.u32 %s358_s13, 4  ;;  %s347_s17 = scalar_lea.sflag [#allocation4], %s725_s12  ;;  %s362_s16 = int_to_ptr.hbm [resolvable:$true] %s361_s16 }
  0x2d   : > { %285 = vmatpush.msra.mxu0 %v255_v7  ;;  %v263_v11 = vadd.s32 4294967288, %v261_v10  ;;  %445 = vmatpush.msk.msra.mxu1 %vm297_vm2, %v291_v16  ;;  %v257_v17 = vld [vmem:[%s787_s2] sm:$0x1]  ;;  %v334_v22 = vadd.s32 8, %v327_v21  ;;  %s551_s29 = sshra.s32 %s362_s16, 4  ;;  %s557_s8 = scalar_lea.hbm %s790_s5, 64  ;;  %s552_s29 = int_to_ptr.hbm [resolvable:$true] %s551_s29 }
  0x2e   : > { %504 = vset.pattern.permute.xlu1 %v327_v21  ;;  %v292_v23 = vld [vmem:[%s789_s4] sm:$0x1]  ;;  %s553_s14 = scalar_lea.hbm %s552_s29, 32  ;;  %p558_p0 = scmp.lt.s32.totalorder %s552_s29, %s790_s5 }
  0x2f   : > { %506 = vset.pattern.permute.xlu0 %v334_v22  ;;  %p554_p6 = scmp.ne.s32.totalorder %s552_s29, %s553_s14  ;;  %p559_p1 = scmp.lt.s32.totalorder %s557_s8, %s553_s14 }
  0x31   : > { %p555_p9 = pnand %p554_p6, %p689_p11  ;;  %p560_p3 = por %p559_p1, %p558_p0 }
  0x33   : > { %p556_p13 = pneg %p555_p9 }
  0x34   : > { %253 = vadd.xlane.f32.xlu0 %v252_v5 }
  0x35   : > { %p561_p4 = pnand %p560_p3, %p556_p13 }
  0x9f   : > { %v251_v9 = vpop.xlane.xlu0 %250 }
  0xa0   : > { %v262_v13 = vperm.slane %v251_v9, %v261_v10 }
  0xa7   : > { %v254_v12 = vpop.xlane.xlu0 %253 }
  0xa8   : > { %v264_v14 = vperm.slane %v254_v12, %v263_v11 }
  0xaa   : > { %v266_v15 = vsel %vm265_vm0, %v264_v14, %v262_v13 }
  0xab   : > { %444 = vmatmul.msk.f32.vlgmr.msra.gmra.mxu0 %vm267_vm1, %v266_v15 }
 0x128   : > { %v287_v18 = vpop.f32.mrf.mxu0 }
 0x129   : > { %v288_v19 = vadd.f32 %v287_v18, %v257_v17 }
 0x12b   : > { %v290_v20 = vmax.f32 %v288_v19, 0.0 }
 0x12d   : > { %446 = vmatmul.msk.f32.vlgmr.msra.gmra.mxu1 %vm293_vm3, %v290_v20 }
 0x1aa   : > { %v318_v24 = vpop.f32.mrf.mxu1 }
 0x1ab   : > { %v319_v25 = vadd.f32 %v318_v24, %v292_v23 }
 0x1ad   : > { %v321_v26 = vadd.f32 3.0, %v319_v25 }
 0x1af   : > { %v322_v27 = vmax.f32 %v321_v26, 0.0 }
 0x1b1   : > { %v323_v28 = vmin.f32 %v322_v27, 6.0 }
 0x1b3   : > { %v324_v29 = vmul.f32 0.16666667, %v323_v28 }
 0x1b5   : > { %v325_v30 = vperm.slane %v324_v29, 0 }
 0x1b7   : > { %330 = vperm.xlu1 %504, %v325_v30  }
 0x1bf   : > { %505 = vset.pattern.permute.xlu1 %v334_v22 }
 0x1c7   : > { %336 = vperm.xlu1 %505, %v325_v30  }
 0x229   : > { %v331_v31 = vpop.permute.xlu1 %330 }
 0x22a   : > { %v338_v32 = vmul.f32 %v331_v31, %v245_v0  ;;  %v339_v33 = vmul.f32 %v331_v31, %v246_v1 }
 0x22c   : > { %342 = vst [vmem:[%s244_s7] sm:$0xff] %v338_v32 }
 0x22d   : > { %343 = vst [vmem:[%s244_s7 + $0x8] sm:$0xff] %v339_v33 }
 0x239   : > { %v337_v34 = vpop.permute.xlu1 %336 }
 0x23a   : > { %v340_v35 = vmul.f32 %v337_v34, %v247_v3  ;;  %v341_v36 = vmul.f32 %v337_v34, %v248_v4 }
 0x23c   : > { %344 = vst [vmem:[%s244_s7 + $0x10] sm:$0xff] %v340_v35 }
 0x23d   : > { %345 = vst [vmem:[%s244_s7 + $0x18] sm:$0xff] %v341_v36 }
 0x23e   : > { %564 = shalt.err (!%p561_p4)
}
 0x23f   : > { %s607_s12 = smov 256   ;;  %s608_s10 = smov 16  }
 0x240   : > { %456 = dma.vmem_to_hbm [thread:$0]  (%p689_p11), %s360_s15, 512, %s362_s16, %s347_s17, %s607_s12, %s607_s12, %s608_s10  }
 0x241 PF: > { %s376_s7 = sand.u32 1, %s591_s18   ;;  %p796_p7 = scmp.ge.s32.totalorder %s603_s21, 2 }
 0x242   : > { %s377_s11 = scalar_lea.sflag [#allocation4], %s376_s7 }
 0x243   : > { %p463_p5 = pnand %p796_p7, %p693_p12 }
 0x245   : > { %p464_p8 = pneg %p463_p5 }
 0x247   : > { %586 = dma.done.wait (%p464_p8), %s377_s11, 512  }
 0x248   : > { %588 = vsyncadd (%p464_p8), %s377_s11, 4294966784  ;;  %p18_p10 = scmp.ge.s32.totalorder %s664_s24, 4   ;;  %s797_s18 = smov %s595_s19 }
 0x249   : > { %s798_s19 = smov %s599_s20  ;;  %s799_s20 = smov %s676_s27 }
 0x24a   : > { %s800_s21 = smov %s664_s24  ;;  %20 = sbr.rel (!%p18_p10) target bundleno = 5 (0x5), region = 85 }
 0x24f   :  { %383 = vsyncpa [#allocation3], 1 }
 0x250   :  { %385 = vsyncpa [#allocation3 + $0x1], 1 }
 0x251   :  { %386 = vsyncpa [#allocation4], 1 }
 0x252   :  { %388 = vsyncpa [#allocation4 + $0x1], 1 }

</bundles_post_ra>
